<compile_context>
chip_gen: v7x
topology: tpu7x:2x2x1
jax: 0.10.0
libtpu: 0.0.40
codegen_flags: <defaults>
</compile_context>

<pallas_src>
import numpy as np

import jax
import jax.numpy as jnp
from jax.experimental import pallas as pl
from jax.experimental.pallas import tpu as pltpu


def _round_up(n, m):
    return ((n + m - 1) // m) * m


def _pick_divisor_tile(dim, max_tile, align):
    """Largest tile <= max_tile that is a multiple of `align` and divides `dim`.

    Falls back to the full dimension (always legal, always correct) when no
    aligned divisor exists, so partial K/N blocks are never generated and no
    uninitialized data can enter the accumulation.
    """
    if dim <= max_tile:
        return dim
    t = (max_tile // align) * align
    while t >= align:
        if dim % t == 0:
            return t
        t -= align
    return dim


def _make_kernel(has_bias, activation, multi_k, compute_dtype):
    def kernel(*refs):
        idx = 0
        x_ref = refs[idx]; idx += 1
        w_ref = refs[idx]; idx += 1
        b_ref = None
        if has_bias:
            b_ref = refs[idx]; idx += 1
        y_ref = refs[idx]; idx += 1
        acc_ref = refs[idx] if multi_k else None

        x = x_ref[...]
        w = w_ref[...]
        if compute_dtype is not None:
            # In-kernel cast (VPU work hidden under the MXU); avoids an extra
            # wrapper-side HBM pass over the activations.
            x = x.astype(compute_dtype)
            w = w.astype(compute_dtype)
        part = jnp.dot(x, w, preferred_element_type=jnp.float32)

        def finish(acc):
            out = acc
            if has_bias:
                out = out + b_ref[...].astype(jnp.float32)
            if activation is not None:
                out = activation(out)
            y_ref[...] = out.astype(y_ref.dtype)

        if multi_k:
            k = pl.program_id(2)

            @pl.when(k == 0)
            def _():
                acc_ref[...] = jnp.zeros_like(acc_ref)

            acc_ref[...] += part

            @pl.when(k == pl.num_programs(2) - 1)
            def _():
                finish(acc_ref[...])
        else:
            finish(part)

    return kernel


def prepare_ff_params(w, b=None, *, weight_dtype=None):
    """Once-per-parameter-set prep (hoisted out of the per-call path).

    Transposes W (size, insize) -> W^T (insize, size), optionally casts the
    weight (e.g. to bf16 for v6e/v7x MXU), and reshapes the bias to (1, size).
    """
    wT = jnp.transpose(jnp.asarray(w))
    if weight_dtype is not None:
        wT = wT.astype(weight_dtype)
    b2 = None if b is None else jnp.asarray(b).reshape(1, -1).astype(jnp.float32)
    return wT, b2


def feed_forward(x, wT, b=None, activation=None, *,
                 block_m=1024,
                 use_bf16_operands=False,
                 out_dtype=None,
                 vmem_budget_bytes=40 << 20,
                 single_buffer_resident=True):
    """y = activation(x @ W^T + b) with pre-transposed weight W^T: (insize, size)."""
    *lead, insize = x.shape
    k_dim, size = wT.shape
    assert insize == k_dim, "weight/input size mismatch"

    M = int(np.prod(lead)) if lead else 1
    x2 = x.reshape(M, insize)

    has_bias = b is not None
    b2 = jnp.asarray(b).reshape(1, size).astype(jnp.float32) if has_bias else None

    if out_dtype is None:
        out_dtype = x.dtype
    compute_dtype = jnp.bfloat16 if use_bf16_operands else None

    x_isz = np.dtype(x2.dtype).itemsize
    w_isz = np.dtype(wT.dtype).itemsize
    o_isz = np.dtype(out_dtype).itemsize

    # ---------------- tile selection ----------------
    # K / N tiles: 128-aligned exact divisors (or the full dim).  Bounds the
    # W^T block so big weights also fit v7x's 64 MiB VMEM; no partial K/N
    # blocks -> no garbage data in the accumulation.
    tk = _pick_divisor_tile(insize, 512, 128)
    tn = _pick_divisor_tile(size, 512, 128)
    nk = insize // tk
    nn = size // tn
    multi_k = nk > 1

    # Row tile: biggest sublane-aligned tile fitting the VMEM budget
    # (double-buffered x/out, worst-case double-buffered weight, f32 acc).
    sub = 16 if use_bf16_operands else 8
    per_row = 2 * tk * x_isz + 2 * tn * o_isz + (tn * 4 if multi_k else 0)
    fixed = 2 * tk * tn * w_isz + (2 * tn * 4 if has_bias else 0)
    avail = max(vmem_budget_bytes - fixed, per_row * sub)
    tm = min(block_m, max(sub, (avail // per_row) // sub * sub))
    tm = min(tm, _round_up(M, sub))
    # Guarantee >=2 row blocks when possible so the "parallel" row axis can
    # shard across the two TensorCores on v7x (harmless on v5e/v6e).
    if M >= 2 * sub and pl.cdiv(M, tm) < 2:
        tm = _round_up(pl.cdiv(M, 2), sub)
    nm = pl.cdiv(M, tm)          # partial last row block: writes masked by Pallas

    weights_resident = (nn == 1 and nk == 1)
    bias_resident = (nn == 1)

    # Explicit scoped-VMEM limit sized from the actual buffers + headroom.
    needed = (2 * tm * tk * x_isz + 2 * tk * tn * w_isz + 2 * tm * tn * o_isz
              + (2 * tn * 4 if has_bias else 0)
              + (tm * tn * 4 if multi_k else 0))
    vmem_limit = int(min(max(needed + (8 << 20), 32 << 20), 100 << 20))

    cost = pl.CostEstimate(
        flops=2 * M * insize * size,
        transcendentals=0,
        bytes_accessed=(M * insize * x_isz + insize * size * w_isz
                        + (size * 4 if has_bias else 0) + M * size * o_isz))

    kernel = _make_kernel(has_bias, activation, multi_k, compute_dtype)
    operands = (x2, wT, b2) if has_bias else (x2, wT)

    def _run(single_buffer):
        def _spec(shape, index_map, resident):
            if single_buffer and resident:
                # Constant index_map -> block is resident; single-buffer it to
                # halve its VMEM footprint.
                return pl.BlockSpec(shape, index_map,
                                    pipeline_mode=pl.Buffered(1))
            return pl.BlockSpec(shape, index_map)

        in_specs = [
            pl.BlockSpec((tm, tk), lambda i, j, k: (i, k)),                 # x rows
            _spec((tk, tn), lambda i, j, k: (k, j), weights_resident),      # W^T
        ]
        if has_bias:
            in_specs.append(_spec((1, tn), lambda i, j, k: (0, j), bias_resident))

        grid_spec = pltpu.PrefetchScalarGridSpec(
            num_scalar_prefetch=0,
            grid=(nm, nn, nk),
            in_specs=in_specs,
            out_specs=pl.BlockSpec((tm, tn), lambda i, j, k: (i, j)),
            scratch_shapes=([pltpu.VMEM((tm, tn), jnp.float32)]
                            if multi_k else []),
        )
        return pl.pallas_call(
            kernel,
            out_shape=jax.ShapeDtypeStruct((M, size), out_dtype),
            grid_spec=grid_spec,
            compiler_params=pltpu.CompilerParams(
                dimension_semantics=("parallel", "parallel", "arbitrary"),
                vmem_limit_bytes=vmem_limit),
            cost_estimate=cost,
        )(*operands)

    if single_buffer_resident and (weights_resident or bias_resident):
        try:
            y = _run(True)
        except Exception:
            # pipeline_mode=pl.Buffered(1) not supported by this jax version:
            # fall back to default double-buffering (correctness unaffected).
            y = _run(False)
    else:
        y = _run(False)

    return y.reshape(*lead, size)


def feed_forward_reference(x, w, b=None, activation=None):
    """Pure-JAX reference matching the PyTorch forward (W in (size, insize))."""
    y = x @ w.T
    if b is not None:
        y = y + b
    if activation is not None:
        y = activation(y)
    return y


if __name__ == "__main__":
    # Small shapes consistent with the module: seq=8, batch=2, insize=16, size=32.
    T, B, insize, size = 8, 2, 16, 32

    key = jax.random.PRNGKey(0)
    kx, kw, kb = jax.random.split(key, 3)

    x = jax.random.normal(kx, (T, B, insize), dtype=jnp.float32)
    # Deterministic synthetic parameters (the scipy-based init is not part of forward).
    w = 0.1 * jax.random.normal(kw, (size, insize), dtype=jnp.float32)
    b = 0.5 * jax.random.normal(kb, (size,), dtype=jnp.float32)

    # Hoisted once per parameter set (transpose + bias reshape), not per call.
    wT, b2 = prepare_ff_params(w, b)

    # taiyaki default activation is `linear` (identity) -> activation=None.
    y = feed_forward(x, wT, b2, activation=None)
    y = jax.block_until_ready(y)

    y_ref = jax.block_until_ready(feed_forward_reference(x, w, b))
    np.testing.assert_allclose(np.asarray(y), np.asarray(y_ref),
                               rtol=1e-5, atol=1e-5)
    print("KERNEL_OK")
</pallas_src>

<mosaic_0001>
module attributes {stable_mosaic.version = 11 : i64} {
  func.func @kernel(%arg0: i32, %arg1: i32, %arg2: i32, %arg3: memref<8x16xf32, #tpu.memory_space<vmem>>, %arg4: memref<16x32xf32, #tpu.memory_space<vmem>>, %arg5: memref<1x32xf32, #tpu.memory_space<vmem>>, %arg6: memref<8x32xf32, #tpu.memory_space<vmem>>) attributes {dimension_semantics = [#tpu.dimension_semantics<parallel>, #tpu.dimension_semantics<parallel>, #tpu.dimension_semantics<arbitrary>], iteration_bounds = array<i64: 2, 1, 1>, scalar_prefetch = 0 : i64, scratch_operands = 0 : i64, tpu.core_type = #tpu.core_type<tc>, window_params = [{transform_indices = @transform_0, window_bounds = array<i64: 8, 16>}, {pipeline_mode = #tpu.pipeline_mode<synchronous>, transform_indices = @transform_1, window_bounds = array<i64: 16, 32>}, {pipeline_mode = #tpu.pipeline_mode<synchronous>, transform_indices = @transform_2, window_bounds = array<i64: 1, 32>}, {transform_indices = @transform_3, window_bounds = array<i64: 8, 32>}]} {
    %c0 = arith.constant 0 : index
    %c0_0 = arith.constant 0 : index
    %0 = vector.load %arg3[%c0, %c0_0] : memref<8x16xf32, #tpu.memory_space<vmem>>, vector<8x16xf32>
    %c0_1 = arith.constant 0 : index
    %c0_2 = arith.constant 0 : index
    %1 = vector.load %arg4[%c0_1, %c0_2] : memref<16x32xf32, #tpu.memory_space<vmem>>, vector<16x32xf32>
    %cst = arith.constant dense<0.000000e+00> : vector<8x32xf32>
    %2 = tpu.matmul %0, %1, %cst {dimension_numbers = #tpu.dot_dimension_numbers<[1], [0], [0], [1], [0, 0, 1, 1], [], []>} : vector<8x16xf32>, vector<16x32xf32>, vector<8x32xf32> -> vector<8x32xf32>
    %c0_3 = arith.constant 0 : index
    %c0_4 = arith.constant 0 : index
    %3 = vector.load %arg5[%c0_3, %c0_4] : memref<1x32xf32, #tpu.memory_space<vmem>>, vector<1x32xf32>
    %4 = vector.broadcast %3 : vector<1x32xf32> to vector<8x32xf32>
    %5 = arith.addf %2, %4 : vector<8x32xf32>
    %c0_5 = arith.constant 0 : index
    %c0_6 = arith.constant 0 : index
    %6 = vector.load %arg6[%c0_5, %c0_6] : memref<8x32xf32, #tpu.memory_space<vmem>>, vector<8x32xf32>
    tpu.vector_store %arg6[%c0_5, %c0_6], %5 {strides = array<i32>} : memref<8x32xf32, #tpu.memory_space<vmem>>, vector<8x32xf32>,
    return
  }
  func.func @transform_0(%arg0: i32, %arg1: i32, %arg2: i32) -> (i32, i32) {
    %c0_i32 = arith.constant 0 : i32
    return %arg0, %arg2 : i32, i32
  }
  func.func @transform_1(%arg0: i32, %arg1: i32, %arg2: i32) -> (i32, i32) {
    %c0_i32 = arith.constant 0 : i32
    return %arg2, %arg1 : i32, i32
  }
  func.func @transform_2(%arg0: i32, %arg1: i32, %arg2: i32) -> (i32, i32) {
    %c0_i32 = arith.constant 0 : i32
    %c0_i32_0 = arith.constant 0 : i32
    return %c0_i32, %arg1 : i32, i32
  }
  func.func @transform_3(%arg0: i32, %arg1: i32, %arg2: i32) -> (i32, i32) {
    %c0_i32 = arith.constant 0 : i32
    return %arg0, %arg1 : i32, i32
  }
}

module attributes {stable_mosaic.version = 11 : i64} {
  func.func @kernel(%arg0: i32, %arg1: i32, %arg2: i32, %arg3: memref<8x16xf32, #tpu.memory_space<vmem>>, %arg4: memref<16x32xf32, #tpu.memory_space<vmem>>, %arg5: memref<1x32xf32, #tpu.memory_space<vmem>>, %arg6: memref<8x32xf32, #tpu.memory_space<vmem>>) attributes {dimension_semantics = [#tpu.dimension_semantics<parallel>, #tpu.dimension_semantics<parallel>, #tpu.dimension_semantics<arbitrary>], iteration_bounds = array<i64: 2, 1, 1>, scalar_prefetch = 0 : i64, scratch_operands = 0 : i64, tpu.core_type = #tpu.core_type<tc>, window_params = [{transform_indices = @transform_0, window_bounds = array<i64: 8, 16>}, {transform_indices = @transform_1, window_bounds = array<i64: 16, 32>}, {transform_indices = @transform_2, window_bounds = array<i64: 1, 32>}, {transform_indices = @transform_3, window_bounds = array<i64: 8, 32>}]} {
    %c0 = arith.constant 0 : index
    %c0_0 = arith.constant 0 : index
    %0 = vector.load %arg3[%c0, %c0_0] : memref<8x16xf32, #tpu.memory_space<vmem>>, vector<8x16xf32>
    %c0_1 = arith.constant 0 : index
    %c0_2 = arith.constant 0 : index
    %1 = vector.load %arg4[%c0_1, %c0_2] : memref<16x32xf32, #tpu.memory_space<vmem>>, vector<16x32xf32>
    %cst = arith.constant dense<0.000000e+00> : vector<8x32xf32>
    %2 = tpu.matmul %0, %1, %cst {dimension_numbers = #tpu.dot_dimension_numbers<[1], [0], [0], [1], [0, 0, 1, 1], [], []>} : vector<8x16xf32>, vector<16x32xf32>, vector<8x32xf32> -> vector<8x32xf32>
    %c0_3 = arith.constant 0 : index
    %c0_4 = arith.constant 0 : index
    %3 = vector.load %arg5[%c0_3, %c0_4] : memref<1x32xf32, #tpu.memory_space<vmem>>, vector<1x32xf32>
    %4 = vector.broadcast %3 : vector<1x32xf32> to vector<8x32xf32>
    %5 = arith.addf %2, %4 : vector<8x32xf32>
    %c0_5 = arith.constant 0 : index
    %c0_6 = arith.constant 0 : index
    %6 = vector.load %arg6[%c0_5, %c0_6] : memref<8x32xf32, #tpu.memory_space<vmem>>, vector<8x32xf32>
    tpu.vector_store %arg6[%c0_5, %c0_6], %5 {strides = array<i32>} : memref<8x32xf32, #tpu.memory_space<vmem>>, vector<8x32xf32>,
    return
  }
  func.func @transform_0(%arg0: i32, %arg1: i32, %arg2: i32) -> (i32, i32) {
    %c0_i32 = arith.constant 0 : i32
    return %arg0, %arg2 : i32, i32
  }
  func.func @transform_1(%arg0: i32, %arg1: i32, %arg2: i32) -> (i32, i32) {
    %c0_i32 = arith.constant 0 : i32
    return %arg2, %arg1 : i32, i32
  }
  func.func @transform_2(%arg0: i32, %arg1: i32, %arg2: i32) -> (i32, i32) {
    %c0_i32 = arith.constant 0 : i32
    %c0_i32_0 = arith.constant 0 : i32
    return %c0_i32, %arg1 : i32, i32
  }
  func.func @transform_3(%arg0: i32, %arg1: i32, %arg2: i32) -> (i32, i32) {
    %c0_i32 = arith.constant 0 : i32
    return %arg0, %arg1 : i32, i32
  }
}

</mosaic_0001>

<bundles_post_ra>
// kernel: tpu_custom_call.1
= control target key start
LH: loop header
LB: loop body
LE: loop exit
PB: predicated region body
PF: predicated region fallthrough
CT: control target
= control target key end

     0   :  { %8 = vsyncpa [#allocation3], 0  ;;  %s961_s0 = inlined_call_operand.hbm [shape: f32[16,16], index: 0, kind: input, shape index: {}]   ;;  %s962_s1 = inlined_call_operand.hbm [shape: f32[16,32], index: 1, kind: input, shape index: {}]   ;;  %s963_s2 = inlined_call_operand.vmem [shape: f32[1,32], index: 2, kind: input, shape index: {}]   ;;  %s964_s3 = inlined_call_operand.hbm [shape: f32[16,32], index: 3, kind: output, shape index: {}]  }
   0x1   :  { %10 = vsyncpa [#allocation3 + $0x1], 0 }
   0x2   :  { %11 = vsyncpa [#allocation6], 0 }
   0x3   :  { %12 = vsyncpa [#allocation4], 0 }
   0x4   :  { %14 = vsyncpa [#allocation4 + $0x1], 0  ;;  %s744_s12 = smov 0   ;;  %s746_s13 = smov 0  }
   0x5   :  { %s748_s14 = smov 0   ;;  %s750_s15 = smov 0  }
   0x6   :  { %s752_s16 = smov 0   ;;  %s754_s17 = smov 0  }
   0x7 LB: > { %s461_s18 = sadd.s32 4294967295, %s714_s17   ;;  %s462_s19 = sadd.s32 4294967294, %s714_s17   ;;  %s714_s17 = sphi %s754_s17, %s20_s17   ;;  %s710_s16 = sphi %s752_s16, %s988_s16   ;;  %s706_s15 = sphi %s750_s15, %s987_s15   ;;  %s702_s14 = sphi %s748_s14, %s986_s14   ;;  %s698_s13 = sphi %s746_s13, %s985_s13   ;;  %s694_s12 = sphi %s744_s12, %s984_s12  }
   0x8   : > { %p61_p0 = scmp.ne.s32.totalorder %s698_s13, %s694_s12  ;;  %p778_p1 = scmp.eq.s32.totalorder %s461_s18, 0 }
   0x9   : > { %p782_p2 = scmp.eq.s32.totalorder %s461_s18, 1  ;;  %p147_p3 = scmp.eq.s32.totalorder %s462_s19, 1 }
   0xa   : > { %s969_s20 = scalar_select %p778_p1, 1, 0 }
   0xb   : > { %s970_s21 = scalar_select %p782_p2, 1, 0 }
   0xc   : > { %p788_p4 = por %p778_p1, %p61_p0  ;;  %p463_p5 = scmp.ge.s32.totalorder %s714_s17, 1 }
   0xd   : > { %p793_p6 = por %p147_p3, %p61_p0  ;;  %p154_p7 = scmp.lt.s32.totalorder %s714_s17, 3 }
   0xe   : > { %s971_s22 = scalar_select %p788_p4, 1, 0 }
   0xf   : > { %s972_s23 = scalar_select %p793_p6, 1, 0 }
  0x10   : > { %p798_p8 = pnand %p463_p5, %p154_p7  ;;  %s716_s25 = smov [#allocation5]  }
  0x11   : > { %s170_s26 = sshll.u32 %s716_s25, 4  ;;  %s39_s28 = sadd.s32 1, %s710_s16  ;;  %s171_s26 = int_to_ptr.vmem [resolvable:$true] %s170_s26 }
  0x12   : > { %s973_s24 = scalar_select %p798_p8, 1, 0 }
  0x13   : > { %p500_p9 = pneg %p798_p8  ;;  %s570_s4 = scalar_lea.hbm %s962_s1, 256 }
  0x14   : > { %p571_p12 = scmp.ne.s32.totalorder %s962_s1, %s570_s4  ;;  %p577_p5 = scmp.lt.u32.totalorder %s570_s4, %s962_s1 }
  0x15   : > { %p807_p11 = pnand %p500_p9, %p778_p1 }
  0x17   : > { %p572_p13 = pneg %p807_p11 }
  0x19   : > { %p573_p0 = pnand %p572_p13, %p571_p12 }
  0x1b   : > { %p574_p3 = pneg %p573_p0 }
  0x1d   : > { %p579_p7 = pnand %p577_p5, %p574_p3 }
  0x1f   : > { %582 = shalt.err (!%p579_p7)
}
  0x20   : > { %s583_s9 = scalar_lea.vmem %s171_s26, 256  ;;  %p591_p1 = scmp.lt.s32.totalorder %s171_s26, %s171_s26 }
  0x21   : > { %p584_p9 = scmp.ne.s32.totalorder %s171_s26, %s583_s9  ;;  %p592_p4 = scmp.lt.s32.totalorder %s583_s9, %s583_s9 }
  0x23   : > { %p586_p10 = pnand %p584_p9, %p572_p13  ;;  %p593_p8 = por %p592_p4, %p591_p1 }
  0x25   : > { %p587_p6 = pneg %p586_p10 }
  0x27   : > { %p594_p2 = pnand %p593_p8, %p587_p6 }
  0x29   : > { %597 = shalt.err (!%p594_p2)
}
  0x2a   : > { %s717_s10 = smov 128   ;;  %s718_s11 = smov 8  }
  0x2b   : > { %503 = dma.hbm_to_vmem [thread:$0]  (!%p807_p11), %s962_s1, 256, %s171_s26, [#allocation6], %s717_s10, %s717_s10, %s718_s11  }
  0x2c   : > { %p41_p1 = scmp.ge.s32.totalorder %s39_s28, 2  ;;  %s48_s25 = sadd.s32 1, %s702_s14 }
  0x2d   : > { %p55_p2 = scmp.ne.s32.totalorder %s702_s14, %s698_s13  ;;  %p56_p4 = scmp.eq.s32.totalorder %s714_s17, 0 }
  0x2e   : > { %s990_s28 = smov (%p41_p1, %s39_s28), 0  ;;  %p976_p8 = scmp.ne.s32.totalorder %s970_s21, 0 }
  0x2f   : > { %p834_p6 = por %p56_p4, %p55_p2  ;;  %s43_s27 = ssub.s32 %s710_s16, %s990_s28 }
  0x30   : > { %p840_p10 = por %p976_p8, %p55_p2  ;;  %p513_p12 = scmp.lt.s32.totalorder %s714_s17, 2 }
  0x31   : > { %p46_p11 = scmp.eq.s32.totalorder %s43_s27, 0  ;;  %s190_s26 = sand.u32 1, %s702_s14  }
  0x32   : > { %s467_s4 = sshll.u32 %s190_s26, 3  ;;  %s468_s6 = sshll.u32 %s710_s16, 7 }
  0x33   : > { %s849_s5 = scalar_select %p46_p11, %s702_s14, %s48_s25  }
  0x34   : > { %s855_s9 = scalar_lea.hbm %s961_s0, %s468_s6  ;;  %s194_s21 = scalar_lea.vmem [#allocation2], %s467_s4 }
  0x35   : > { %s202_s10 = sshll.u32 %s194_s21, 4  ;;  %p861_p13 = pnand %p513_p12, %p834_p6  ;;  %s857_s10 = int_to_ptr.vmem [resolvable:$true] %s202_s10 }
  0x36   : > { %s191_s18 = scalar_lea.sflag [#allocation3], %s190_s26  ;;  %s598_s19 = scalar_lea.hbm %s855_s9, 128 }
  0x37   : > { %p599_p0 = scmp.ne.s32.totalorder %s855_s9, %s598_s19  ;;  %p600_p3 = pneg %p861_p13 }
  0x38   : > { %s603_s4 = scalar_lea.hbm %s961_s0, 256  ;;  %p604_p9 = scmp.lt.u32.totalorder %s855_s9, %s961_s0 }
  0x39   : > { %p601_p5 = pnand %p600_p3, %p599_p0  ;;  %p605_p1 = scmp.lt.u32.totalorder %s603_s4, %s598_s19 }
  0x3a   : > { %p607_p4 = scmp.lt.u32.totalorder %s598_s19, %s855_s9 }
  0x3b   : > { %p602_p7 = pneg %p601_p5  ;;  %p606_p2 = por %p605_p1, %p604_p9 }
  0x3d   : > { %p608_p6 = por %p607_p4, %p606_p2 }
  0x3f   : > { %p609_p8 = pnand %p608_p6, %p602_p7 }
  0x41   : > { %612 = shalt.err (!%p609_p8)
}
  0x42   : > { %s613_s26 = scalar_lea.vmem %s857_s10, 128  ;;  %s719_s7 = smov [#allocation2]  }
  0x43   : > { %p614_p12 = scmp.ne.s32.totalorder %s857_s10, %s613_s26  ;;  %s618_s8 = sshll.u32 %s719_s7, 4  ;;  %s619_s8 = int_to_ptr.vmem [resolvable:$false] %s618_s8 }
  0x44   : > { %s620_s21 = scalar_lea.vmem %s619_s8, 256  ;;  %p621_p5 = scmp.lt.s32.totalorder %s857_s10, %s619_s8 }
  0x45   : > { %p616_p11 = pnand %p614_p12, %p600_p3  ;;  %p622_p9 = scmp.lt.s32.totalorder %s620_s21, %s613_s26 }
  0x47   : > { %p617_p0 = pneg %p616_p11  ;;  %p623_p1 = por %p622_p9, %p621_p5 }
  0x49   : > { %p624_p2 = pnand %p623_p1, %p617_p0 }
  0x4b   : > { %627 = shalt.err (!%p624_p2)
}
  0x4c   : > { %507 = dma.hbm_to_vmem [thread:$0]  (!%p861_p13), %s855_s9, 128, %s857_s10, %s191_s18  }
  0x4d   : > { %p979_p7 = scmp.ne.s32.totalorder %s973_s24, 0 }
  0x4e   : > { %s893_s19 = sand.u32 (!%p979_p7), 1, %s698_s13   ;;  %p980_p3 = scmp.ne.s32.totalorder (!%p979_p7), %s971_s22, 0 }
  0x4f   : > { %211 = sbr.rel (%p979_p7) target bundleno = 325 (0x145), region = 32  ;;  %s470_s25 = sshll.u32 (!%p979_p7), %s893_s19, 3 }
  0x50   : > { %s214_s27 = scalar_lea.sflag (!%p979_p7), [#allocation3], %s893_s19  ;;  %s217_s4 = scalar_lea.vmem (!%p979_p7), [#allocation2], %s470_s25 }
  0x56   : > { %681 = dma.done.wait (%p980_p3), %s214_s27, 128  }
  0x57   : > { %683 = vsyncadd (%p980_p3), %s214_s27, 4294967168  ;;  %p981_p4 = scmp.ne.s32.totalorder %s969_s20, 0 }
  0x59   : > { %685 = dma.done.wait (%p981_p4), [#allocation6], 256  }
  0x5a   : > { %687 = vsyncadd (%p981_p4), [#allocation6], 4294967040  ;;  %v720_v0 = vmov 0.0|0.0   ;;  %vm721_vm0 = vmmov 0   ;;  %v722_v1 = vmov 0.0   ;;  %v252_v2 = vld [vmem:[#allocation5] sm:$0xff] }
  0x5b   : > { %489 = vmatprep.subr.bf16.mxu0 %v720_v0  ;;  %486 = vmatprep.mubr.msk.f32.mxu0 %vm721_vm0, %v722_v1  ;;  %v253_v3 = vld [vmem:[#allocation5 + $0x8] sm:$0xff]  ;;  %v251_v5 = vld [vmem:[%s217_s4] sm:$0xff]  ;;  %vm261_vm1 = vcmask 130048   ;;  %s476_s20 = sshll.u32 %s706_s15, 7  ;;  %s246_s9 = scalar_lea.vmem [#allocation7], %s470_s25  ;;  %vm335_vm2 = vcmask 261120  }
  0x5c   : > { %v490_v4 = vpack.c.bf16 %v253_v3, %v252_v2  ;;  %v473_v6 = vld [vmem:[%s963_s2] ss:$0 sm:$0xff]  ;;  %s352_s10 = sshll.u32 %s246_s9, 4  ;;  %s912_s29 = scalar_lea.hbm %s964_s3, %s476_s20  ;;  %s914_s10 = int_to_ptr.vmem [resolvable:$true] %s352_s10 }
  0x5d   : > { %s338_s6 = scalar_lea.sflag [#allocation4], %s893_s19  ;;  %s628_s26 = scalar_lea.vmem %s914_s10, 128 }
  0x5e   : > { %491 = vmatpush3.bf16.msra.mxu0 %v490_v4  ;;  %p629_p13 = scmp.ne.s32.totalorder %s914_s10, %s628_s26  ;;  %s723_s15 = smov [#allocation7]  }
  0x5f   : > { %s632_s7 = sshll.u32 %s723_s15, 4  ;;  %s633_s7 = int_to_ptr.vmem [resolvable:$false] %s632_s7 }
  0x60   : > { %p630_p6 = pnand %p629_p13, %p840_p10  ;;  %s634_s8 = scalar_lea.vmem %s633_s7, 256 }
  0x61   : > { %487 = vmatmul.mubr.msk.f32.vlgmr.msra.gmra.mrb[0].mxu0 %vm261_vm1, %v251_v5  ;;  %p635_p12 = scmp.lt.s32.totalorder %s914_s10, %s633_s7  ;;  %p636_p11 = scmp.lt.s32.totalorder %s634_s8, %s628_s26 }
  0x62   : > { %p631_p8 = pneg %p630_p6 }
  0x63   : > { %p637_p0 = por %p636_p11, %p635_p12 }
  0x65   : > { %p638_p5 = pnand %p637_p0, %p631_p8 }
 0x134   : > { %v331_v7 = vpop.f32.mrb[0].mxu0 }
 0x135   : > { %v332_v8 = vadd.f32 %v473_v6, %v331_v7  ;;  %v488_v9 = vpop.f32.mrb[1].mxu0 }
 0x137   : > { %336 = vst.msk [vmem:[%s246_s9] sm:$0xff] %vm335_vm2, %v332_v8 }
 0x138   : > { %641 = shalt.err (!%p638_p5)
}
 0x139   : > { %s642_s21 = scalar_lea.hbm %s912_s29, 128  ;;  %s646_s27 = scalar_lea.hbm %s964_s3, 256 }
 0x13a   : > { %p643_p9 = scmp.ne.s32.totalorder %s912_s29, %s642_s21  ;;  %p647_p7 = scmp.lt.u32.totalorder %s912_s29, %s964_s3 }
 0x13b   : > { %p648_p3 = scmp.lt.u32.totalorder %s646_s27, %s642_s21  ;;  %p650_p13 = scmp.lt.u32.totalorder %s642_s21, %s912_s29 }
 0x13c   : > { %p644_p1 = pnand %p643_p9, %p840_p10 }
 0x13d   : > { %p649_p4 = por %p648_p3, %p647_p7 }
 0x13e   : > { %p645_p2 = pneg %p644_p1 }
 0x13f   : > { %p651_p6 = por %p650_p13, %p649_p4 }
 0x141   : > { %p652_p8 = pnand %p651_p6, %p645_p2 }
 0x143   : > { %655 = shalt.err (!%p652_p8)
}
 0x144   : > { %498 = dma.vmem_to_hbm [thread:$0]  (%p840_p10), %s914_s10, 128, %s912_s29, %s338_s6  }
 0x145 PF: > { %s364_s24 = sand.u32 1, %s694_s12   ;;  %p982_p12 = scmp.ne.s32.totalorder %s972_s23, 0 }
 0x146   : > { %p983_p11 = scmp.ge.s32.totalorder %s714_s17, 2  ;;  %s365_s20 = scalar_lea.sflag [#allocation4], %s364_s24 }
 0x148   : > { %p509_p0 = pnand %p983_p11, %p982_p12 }
 0x14a   : > { %689 = dma.done.wait (!%p509_p0), %s365_s20, 128  }
 0x14b   : > { %691 = vsyncadd (!%p509_p0), %s365_s20, 4294967168  ;;  %s20_s17 = sadd.s32 1, %s714_s17   ;;  %s984_s12 = smov %s698_s13 }
 0x14c   : > { %p17_p5 = scmp.ge.s32.totalorder %s20_s17, 4   ;;  %s985_s13 = smov %s702_s14 }
 0x14d   : > { %s986_s14 = smov %s849_s5  ;;  %s987_s15 = smov %s710_s16 }
 0x14e   : > { %s988_s16 = smov %s990_s28  ;;  %19 = sbr.rel (!%p17_p5) target bundleno = 7 (0x7), region = 85 }
 0x155   :  { %370 = vsyncpa [#allocation3], 1 }
 0x156   :  { %372 = vsyncpa [#allocation3 + $0x1], 1 }
 0x157   :  { %373 = vsyncpa [#allocation6], 1 }
 0x158   :  { %374 = vsyncpa [#allocation4], 1 }
 0x159   :  { %376 = vsyncpa [#allocation4 + $0x1], 1 }

// kernel: tpu_custom_call.1
= control target key start
LH: loop header
LB: loop body
LE: loop exit
PB: predicated region body
PF: predicated region fallthrough
CT: control target
= control target key end

     0   :  { %8 = vsyncpa [#allocation3], 0  ;;  %s961_s0 = inlined_call_operand.hbm [shape: f32[16,16], index: 0, kind: input, shape index: {}]   ;;  %s962_s1 = inlined_call_operand.hbm [shape: f32[16,32], index: 1, kind: input, shape index: {}]   ;;  %s963_s2 = inlined_call_operand.vmem [shape: f32[1,32], index: 2, kind: input, shape index: {}]   ;;  %s964_s3 = inlined_call_operand.hbm [shape: f32[16,32], index: 3, kind: output, shape index: {}]  }
   0x1   :  { %10 = vsyncpa [#allocation3 + $0x1], 0 }
   0x2   :  { %11 = vsyncpa [#allocation6], 0 }
   0x3   :  { %12 = vsyncpa [#allocation4], 0 }
   0x4   :  { %14 = vsyncpa [#allocation4 + $0x1], 0  ;;  %s744_s12 = smov 0   ;;  %s746_s13 = smov 0  }
   0x5   :  { %s748_s14 = smov 0   ;;  %s750_s15 = smov 0  }
   0x6   :  { %s752_s16 = smov 0   ;;  %s754_s17 = smov 0  }
   0x7 LB: > { %s461_s18 = sadd.s32 4294967295, %s714_s17   ;;  %s462_s19 = sadd.s32 4294967294, %s714_s17   ;;  %s714_s17 = sphi %s754_s17, %s20_s17   ;;  %s710_s16 = sphi %s752_s16, %s988_s16   ;;  %s706_s15 = sphi %s750_s15, %s987_s15   ;;  %s702_s14 = sphi %s748_s14, %s986_s14   ;;  %s698_s13 = sphi %s746_s13, %s985_s13   ;;  %s694_s12 = sphi %s744_s12, %s984_s12  }
   0x8   : > { %p61_p0 = scmp.ne.s32.totalorder %s698_s13, %s694_s12  ;;  %p778_p1 = scmp.eq.s32.totalorder %s461_s18, 0 }
   0x9   : > { %p782_p2 = scmp.eq.s32.totalorder %s461_s18, 1  ;;  %p147_p3 = scmp.eq.s32.totalorder %s462_s19, 1 }
   0xa   : > { %s969_s20 = scalar_select %p778_p1, 1, 0 }
   0xb   : > { %s970_s21 = scalar_select %p782_p2, 1, 0 }
   0xc   : > { %p788_p4 = por %p778_p1, %p61_p0  ;;  %p463_p5 = scmp.ge.s32.totalorder %s714_s17, 1 }
   0xd   : > { %p793_p6 = por %p147_p3, %p61_p0  ;;  %p154_p7 = scmp.lt.s32.totalorder %s714_s17, 3 }
   0xe   : > { %s971_s22 = scalar_select %p788_p4, 1, 0 }
   0xf   : > { %s972_s23 = scalar_select %p793_p6, 1, 0 }
  0x10   : > { %p798_p8 = pnand %p463_p5, %p154_p7  ;;  %s716_s25 = smov [#allocation5]  }
  0x11   : > { %s170_s26 = sshll.u32 %s716_s25, 4  ;;  %s39_s28 = sadd.s32 1, %s710_s16  ;;  %s171_s26 = int_to_ptr.vmem [resolvable:$true] %s170_s26 }
  0x12   : > { %s973_s24 = scalar_select %p798_p8, 1, 0 }
  0x13   : > { %p500_p9 = pneg %p798_p8  ;;  %s570_s4 = scalar_lea.hbm %s962_s1, 256 }
  0x14   : > { %p571_p12 = scmp.ne.s32.totalorder %s962_s1, %s570_s4  ;;  %p577_p5 = scmp.lt.u32.totalorder %s570_s4, %s962_s1 }
  0x15   : > { %p807_p11 = pnand %p500_p9, %p778_p1 }
  0x17   : > { %p572_p13 = pneg %p807_p11 }
  0x19   : > { %p573_p0 = pnand %p572_p13, %p571_p12 }
  0x1b   : > { %p574_p3 = pneg %p573_p0 }
  0x1d   : > { %p579_p7 = pnand %p577_p5, %p574_p3 }
  0x1f   : > { %582 = shalt.err (!%p579_p7)
}
  0x20   : > { %s583_s9 = scalar_lea.vmem %s171_s26, 256  ;;  %p591_p1 = scmp.lt.s32.totalorder %s171_s26, %s171_s26 }
  0x21   : > { %p584_p9 = scmp.ne.s32.totalorder %s171_s26, %s583_s9  ;;  %p592_p4 = scmp.lt.s32.totalorder %s583_s9, %s583_s9 }
  0x23   : > { %p586_p10 = pnand %p584_p9, %p572_p13  ;;  %p593_p8 = por %p592_p4, %p591_p1 }
  0x25   : > { %p587_p6 = pneg %p586_p10 }
  0x27   : > { %p594_p2 = pnand %p593_p8, %p587_p6 }
  0x29   : > { %597 = shalt.err (!%p594_p2)
}
  0x2a   : > { %s717_s10 = smov 128   ;;  %s718_s11 = smov 8  }
  0x2b   : > { %503 = dma.hbm_to_vmem [thread:$0]  (!%p807_p11), %s962_s1, 256, %s171_s26, [#allocation6], %s717_s10, %s717_s10, %s718_s11  }
  0x2c   : > { %p41_p1 = scmp.ge.s32.totalorder %s39_s28, 2  ;;  %s48_s25 = sadd.s32 1, %s702_s14 }
  0x2d   : > { %p55_p2 = scmp.ne.s32.totalorder %s702_s14, %s698_s13  ;;  %p56_p4 = scmp.eq.s32.totalorder %s714_s17, 0 }
  0x2e   : > { %s990_s28 = smov (%p41_p1, %s39_s28), 0  ;;  %p976_p8 = scmp.ne.s32.totalorder %s970_s21, 0 }
  0x2f   : > { %p834_p6 = por %p56_p4, %p55_p2  ;;  %s43_s27 = ssub.s32 %s710_s16, %s990_s28 }
  0x30   : > { %p840_p10 = por %p976_p8, %p55_p2  ;;  %p513_p12 = scmp.lt.s32.totalorder %s714_s17, 2 }
  0x31   : > { %p46_p11 = scmp.eq.s32.totalorder %s43_s27, 0  ;;  %s190_s26 = sand.u32 1, %s702_s14  }
  0x32   : > { %s467_s4 = sshll.u32 %s190_s26, 3  ;;  %s468_s6 = sshll.u32 %s710_s16, 7 }
  0x33   : > { %s849_s5 = scalar_select %p46_p11, %s702_s14, %s48_s25  }
  0x34   : > { %s855_s9 = scalar_lea.hbm %s961_s0, %s468_s6  ;;  %s194_s21 = scalar_lea.vmem [#allocation2], %s467_s4 }
  0x35   : > { %s202_s10 = sshll.u32 %s194_s21, 4  ;;  %p861_p13 = pnand %p513_p12, %p834_p6  ;;  %s857_s10 = int_to_ptr.vmem [resolvable:$true] %s202_s10 }
  0x36   : > { %s191_s18 = scalar_lea.sflag [#allocation3], %s190_s26  ;;  %s598_s19 = scalar_lea.hbm %s855_s9, 128 }
  0x37   : > { %p599_p0 = scmp.ne.s32.totalorder %s855_s9, %s598_s19  ;;  %p600_p3 = pneg %p861_p13 }
  0x38   : > { %s603_s4 = scalar_lea.hbm %s961_s0, 256  ;;  %p604_p9 = scmp.lt.u32.totalorder %s855_s9, %s961_s0 }
  0x39   : > { %p601_p5 = pnand %p600_p3, %p599_p0  ;;  %p605_p1 = scmp.lt.u32.totalorder %s603_s4, %s598_s19 }
  0x3a   : > { %p607_p4 = scmp.lt.u32.totalorder %s598_s19, %s855_s9 }
  0x3b   : > { %p602_p7 = pneg %p601_p5  ;;  %p606_p2 = por %p605_p1, %p604_p9 }
  0x3d   : > { %p608_p6 = por %p607_p4, %p606_p2 }
  0x3f   : > { %p609_p8 = pnand %p608_p6, %p602_p7 }
  0x41   : > { %612 = shalt.err (!%p609_p8)
}
  0x42   : > { %s613_s26 = scalar_lea.vmem %s857_s10, 128  ;;  %s719_s7 = smov [#allocation2]  }
  0x43   : > { %p614_p12 = scmp.ne.s32.totalorder %s857_s10, %s613_s26  ;;  %s618_s8 = sshll.u32 %s719_s7, 4  ;;  %s619_s8 = int_to_ptr.vmem [resolvable:$false] %s618_s8 }
  0x44   : > { %s620_s21 = scalar_lea.vmem %s619_s8, 256  ;;  %p621_p5 = scmp.lt.s32.totalorder %s857_s10, %s619_s8 }
  0x45   : > { %p616_p11 = pnand %p614_p12, %p600_p3  ;;  %p622_p9 = scmp.lt.s32.totalorder %s620_s21, %s613_s26 }
  0x47   : > { %p617_p0 = pneg %p616_p11  ;;  %p623_p1 = por %p622_p9, %p621_p5 }
  0x49   : > { %p624_p2 = pnand %p623_p1, %p617_p0 }
  0x4b   : > { %627 = shalt.err (!%p624_p2)
}
  0x4c   : > { %507 = dma.hbm_to_vmem [thread:$0]  (!%p861_p13), %s855_s9, 128, %s857_s10, %s191_s18  }
  0x4d   : > { %p979_p7 = scmp.ne.s32.totalorder %s973_s24, 0 }
  0x4e   : > { %s893_s19 = sand.u32 (!%p979_p7), 1, %s698_s13   ;;  %p980_p3 = scmp.ne.s32.totalorder (!%p979_p7), %s971_s22, 0 }
  0x4f   : > { %211 = sbr.rel (%p979_p7) target bundleno = 325 (0x145), region = 32  ;;  %s470_s25 = sshll.u32 (!%p979_p7), %s893_s19, 3 }
  0x50   : > { %s214_s27 = scalar_lea.sflag (!%p979_p7), [#allocation3], %s893_s19  ;;  %s217_s4 = scalar_lea.vmem (!%p979_p7), [#allocation2], %s470_s25 }
  0x56   : > { %681 = dma.done.wait (%p980_p3), %s214_s27, 128  }
  0x57   : > { %683 = vsyncadd (%p980_p3), %s214_s27, 4294967168  ;;  %p981_p4 = scmp.ne.s32.totalorder %s969_s20, 0 }
  0x59   : > { %685 = dma.done.wait (%p981_p4), [#allocation6], 256  }
  0x5a   : > { %687 = vsyncadd (%p981_p4), [#allocation6], 4294967040  ;;  %v720_v0 = vmov 0.0|0.0   ;;  %vm721_vm0 = vmmov 0   ;;  %v722_v1 = vmov 0.0   ;;  %v252_v2 = vld [vmem:[#allocation5] sm:$0xff] }
  0x5b   : > { %489 = vmatprep.subr.bf16.mxu0 %v720_v0  ;;  %486 = vmatprep.mubr.msk.f32.mxu0 %vm721_vm0, %v722_v1  ;;  %v253_v3 = vld [vmem:[#allocation5 + $0x8] sm:$0xff]  ;;  %v251_v5 = vld [vmem:[%s217_s4] sm:$0xff]  ;;  %vm261_vm1 = vcmask 130048   ;;  %s476_s20 = sshll.u32 %s706_s15, 7  ;;  %s246_s9 = scalar_lea.vmem [#allocation7], %s470_s25  ;;  %vm335_vm2 = vcmask 261120  }
  0x5c   : > { %v490_v4 = vpack.c.bf16 %v253_v3, %v252_v2  ;;  %v473_v6 = vld [vmem:[%s963_s2] ss:$0 sm:$0xff]  ;;  %s352_s10 = sshll.u32 %s246_s9, 4  ;;  %s912_s29 = scalar_lea.hbm %s964_s3, %s476_s20  ;;  %s914_s10 = int_to_ptr.vmem [resolvable:$true] %s352_s10 }
  0x5d   : > { %s338_s6 = scalar_lea.sflag [#allocation4], %s893_s19  ;;  %s628_s26 = scalar_lea.vmem %s914_s10, 128 }
  0x5e   : > { %491 = vmatpush3.bf16.msra.mxu0 %v490_v4  ;;  %p629_p13 = scmp.ne.s32.totalorder %s914_s10, %s628_s26  ;;  %s723_s15 = smov [#allocation7]  }
  0x5f   : > { %s632_s7 = sshll.u32 %s723_s15, 4  ;;  %s633_s7 = int_to_ptr.vmem [resolvable:$false] %s632_s7 }
  0x60   : > { %p630_p6 = pnand %p629_p13, %p840_p10  ;;  %s634_s8 = scalar_lea.vmem %s633_s7, 256 }
  0x61   : > { %487 = vmatmul.mubr.msk.f32.vlgmr.msra.gmra.mrb[0].mxu0 %vm261_vm1, %v251_v5  ;;  %p635_p12 = scmp.lt.s32.totalorder %s914_s10, %s633_s7  ;;  %p636_p11 = scmp.lt.s32.totalorder %s634_s8, %s628_s26 }
  0x62   : > { %p631_p8 = pneg %p630_p6 }
  0x63   : > { %p637_p0 = por %p636_p11, %p635_p12 }
  0x65   : > { %p638_p5 = pnand %p637_p0, %p631_p8 }
 0x134   : > { %v331_v7 = vpop.f32.mrb[0].mxu0 }
 0x135   : > { %v332_v8 = vadd.f32 %v473_v6, %v331_v7  ;;  %v488_v9 = vpop.f32.mrb[1].mxu0 }
 0x137   : > { %336 = vst.msk [vmem:[%s246_s9] sm:$0xff] %vm335_vm2, %v332_v8 }
 0x138   : > { %641 = shalt.err (!%p638_p5)
}
 0x139   : > { %s642_s21 = scalar_lea.hbm %s912_s29, 128  ;;  %s646_s27 = scalar_lea.hbm %s964_s3, 256 }
 0x13a   : > { %p643_p9 = scmp.ne.s32.totalorder %s912_s29, %s642_s21  ;;  %p647_p7 = scmp.lt.u32.totalorder %s912_s29, %s964_s3 }
 0x13b   : > { %p648_p3 = scmp.lt.u32.totalorder %s646_s27, %s642_s21  ;;  %p650_p13 = scmp.lt.u32.totalorder %s642_s21, %s912_s29 }
 0x13c   : > { %p644_p1 = pnand %p643_p9, %p840_p10 }
 0x13d   : > { %p649_p4 = por %p648_p3, %p647_p7 }
 0x13e   : > { %p645_p2 = pneg %p644_p1 }
 0x13f   : > { %p651_p6 = por %p650_p13, %p649_p4 }
 0x141   : > { %p652_p8 = pnand %p651_p6, %p645_p2 }
 0x143   : > { %655 = shalt.err (!%p652_p8)
}
 0x144   : > { %498 = dma.vmem_to_hbm [thread:$0]  (%p840_p10), %s914_s10, 128, %s912_s29, %s338_s6  }
 0x145 PF: > { %s364_s24 = sand.u32 1, %s694_s12   ;;  %p982_p12 = scmp.ne.s32.totalorder %s972_s23, 0 }
 0x146   : > { %p983_p11 = scmp.ge.s32.totalorder %s714_s17, 2  ;;  %s365_s20 = scalar_lea.sflag [#allocation4], %s364_s24 }
 0x148   : > { %p509_p0 = pnand %p983_p11, %p982_p12 }
 0x14a   : > { %689 = dma.done.wait (!%p509_p0), %s365_s20, 128  }
 0x14b   : > { %691 = vsyncadd (!%p509_p0), %s365_s20, 4294967168  ;;  %s20_s17 = sadd.s32 1, %s714_s17   ;;  %s984_s12 = smov %s698_s13 }
 0x14c   : > { %p17_p5 = scmp.ge.s32.totalorder %s20_s17, 4   ;;  %s985_s13 = smov %s702_s14 }
 0x14d   : > { %s986_s14 = smov %s849_s5  ;;  %s987_s15 = smov %s710_s16 }
 0x14e   : > { %s988_s16 = smov %s990_s28  ;;  %19 = sbr.rel (!%p17_p5) target bundleno = 7 (0x7), region = 85 }
 0x155   :  { %370 = vsyncpa [#allocation3], 1 }
 0x156   :  { %372 = vsyncpa [#allocation3 + $0x1], 1 }
 0x157   :  { %373 = vsyncpa [#allocation6], 1 }
 0x158   :  { %374 = vsyncpa [#allocation4], 1 }
 0x159   :  { %376 = vsyncpa [#allocation4 + $0x1], 1 }

</bundles_post_ra>
